<compile_context>
chip_gen: v6e
topology: v6e:2x2x1
jax: 0.10.0
libtpu: 0.0.40
codegen_flags: <defaults>
</compile_context>

<pallas_src>
import functools
import math

import jax
import jax.numpy as jnp
from jax.experimental import pallas as pl
from jax.experimental.pallas import tpu as pltpu


def _round_up(x, m):
    return (x + m - 1) // m * m


def _stft_loss_kernel(xf_ref, yf_ref, basis_ref, sc_ref, mag_ref, acc_ref,
                      *, n_frames, n_bins):
    """One (batch, frame-tile) step: fused windowed-DFT matmuls, magnitudes,
    and running SC / log-magnitude reductions held in SMEM scratch."""
    t = pl.program_id(1)
    n_tiles = pl.num_programs(1)
    tile_frames = xf_ref.shape[0]
    k_pad = basis_ref.shape[1] // 2

    @pl.when(t == 0)
    def _():
        acc_ref[0] = jnp.float32(0.0)   # sum (y_mag - x_mag)^2
        acc_ref[1] = jnp.float32(0.0)   # sum y_mag^2
        acc_ref[2] = jnp.float32(0.0)   # sum |log(y_mag) - log(x_mag)|

    # Fused [cos | sin] basis: one bf16 MXU matmul per signal, f32 accumulate.
    basis = basis_ref[...]
    xz = jnp.dot(xf_ref[...], basis, preferred_element_type=jnp.float32)
    yz = jnp.dot(yf_ref[...], basis, preferred_element_type=jnp.float32)

    xr, xi = xz[:, :k_pad], xz[:, k_pad:]
    yr, yi = yz[:, :k_pad], yz[:, k_pad:]

    eps = 1e-7  # clamp before sqrt/log (avoids -inf / NaN on silent bins)
    x_mag = jnp.sqrt(jnp.maximum(xr * xr + xi * xi, eps))
    y_mag = jnp.sqrt(jnp.maximum(yr * yr + yi * yi, eps))

    # Mask padded frames (row >= n_frames) and padded bins (col >= n_bins).
    row = (jax.lax.broadcasted_iota(jnp.int32, (tile_frames, k_pad), 0)
           + t * tile_frames)
    col = jax.lax.broadcasted_iota(jnp.int32, (tile_frames, k_pad), 1)
    mask = jnp.where((row < n_frames) & (col < n_bins), 1.0, 0.0)
    mask = mask.astype(jnp.float32)

    diff = y_mag - x_mag
    # One log + one EUP approx reciprocal instead of two logs.
    log_ratio = jnp.log(y_mag * pl.reciprocal(x_mag, approx=True))

    acc_ref[0] += jnp.sum(mask * (diff * diff))
    acc_ref[1] += jnp.sum(mask * (y_mag * y_mag))
    acc_ref[2] += jnp.sum(mask * jnp.abs(log_ratio))

    @pl.when(t == n_tiles - 1)
    def _():
        # Spectral convergence: ||y - x||_F / ||y||_F  (per batch element).
        sc = jnp.sqrt(acc_ref[0] / acc_ref[1])
        # TODO(synk): the reference's `L1Loss` (with `dim=3`) is not defined in
        # the provided source; we use a per-batch mean absolute log-mag error.
        ml = acc_ref[2] / jnp.float32(n_frames * n_bins)
        sc_ref[...] = jnp.full(sc_ref.shape, sc, dtype=jnp.float32)
        mag_ref[...] = jnp.full(mag_ref.shape, ml, dtype=jnp.float32)


def _frame_signal(x, fft_size, hop_size, padded_frames):
    """torch.stft framing (center=True, reflect padding), zero-padded along the
    frame axis to `padded_frames`."""
    B, T = x.shape
    pad = fft_size // 2
    xp = jnp.pad(x, ((0, 0), (pad, pad)), mode="reflect")
    n_frames = 1 + T // hop_size
    idx = (jnp.arange(n_frames)[:, None] * hop_size
           + jnp.arange(fft_size)[None, :])
    xf = xp[:, idx]                               # (B, n_frames, fft_size)
    if padded_frames > n_frames:
        xf = jnp.pad(xf, ((0, 0), (0, padded_frames - n_frames), (0, 0)))
    return xf


def _make_fused_basis(fft_size, win_length, k_pad):
    """Hann(win_length) window (torch periodic convention), centered to
    fft_size, baked into a fused one-sided real-DFT basis [cos | sin], each
    half padded to k_pad lanes; returned in bf16."""
    n = jnp.arange(win_length, dtype=jnp.float32)
    window = 0.5 - 0.5 * jnp.cos(2.0 * math.pi * n / win_length)
    lpad = (fft_size - win_length) // 2
    w = jnp.pad(window, (lpad, fft_size - win_length - lpad))
    n_bins = fft_size // 2 + 1
    nn = jnp.arange(fft_size, dtype=jnp.float32)[:, None]
    kk = jnp.arange(n_bins, dtype=jnp.float32)[None, :]
    ang = 2.0 * math.pi * nn * kk / fft_size
    cos_b = jnp.pad(w[:, None] * jnp.cos(ang), ((0, 0), (0, k_pad - n_bins)))
    sin_b = jnp.pad(w[:, None] * jnp.sin(ang), ((0, 0), (0, k_pad - n_bins)))
    return jnp.concatenate([cos_b, sin_b], axis=1).astype(jnp.bfloat16)


def stft_loss(x, y, fft_size=1024, shift_size=120, win_length=600,
              frame_tile=256):
    """STFTLoss.forward: returns (sc_loss, mag_loss), each of shape (B,)."""
    B, T = x.shape
    n_frames = 1 + T // shift_size
    n_bins = fft_size // 2 + 1
    k_pad = _round_up(n_bins, 128)
    tf = min(frame_tile, _round_up(n_frames, 8))
    padded_frames = _round_up(n_frames, tf)
    n_tiles = padded_frames // tf

    # bf16 frames halve HBM/DMA traffic; MXU accumulates in f32.
    xf = _frame_signal(x.astype(jnp.bfloat16), fft_size, shift_size,
                       padded_frames)
    yf = _frame_signal(y.astype(jnp.bfloat16), fft_size, shift_size,
                       padded_frames)
    basis = _make_fused_basis(fft_size, win_length, k_pad)

    kernel = functools.partial(_stft_loss_kernel, n_frames=n_frames,
                               n_bins=n_bins)

    sc, mag = pl.pallas_call(
        kernel,
        grid=(B, n_tiles),
        in_specs=[
            pl.BlockSpec((None, tf, fft_size), lambda b, t: (b, t, 0)),
            pl.BlockSpec((None, tf, fft_size), lambda b, t: (b, t, 0)),
            # Constant block index -> bases stay VMEM-resident across the grid.
            pl.BlockSpec((fft_size, 2 * k_pad), lambda b, t: (0, 0)),
        ],
        out_specs=(
            pl.BlockSpec((None, 8, 128), lambda b, t: (b, 0, 0)),
            pl.BlockSpec((None, 8, 128), lambda b, t: (b, 0, 0)),
        ),
        out_shape=(
            jax.ShapeDtypeStruct((B, 8, 128), jnp.float32),
            jax.ShapeDtypeStruct((B, 8, 128), jnp.float32),
        ),
        scratch_shapes=[pltpu.SMEM((3,), jnp.float32)],
        compiler_params=pltpu.CompilerParams(
            dimension_semantics=("parallel", "arbitrary")),
    )(xf, yf, basis)

    return sc[:, 0, 0], mag[:, 0, 0]


if __name__ == "__main__":
    key = jax.random.PRNGKey(0)
    kx, ky = jax.random.split(key)

    # Small shapes consistent with the module (real defaults are 1024/120/600).
    B, T = 2, 512
    fft_size, shift_size, win_length = 128, 32, 80

    x = jax.random.normal(kx, (B, T), dtype=jnp.float32)
    y = jax.random.normal(ky, (B, T), dtype=jnp.float32)

    sc, mag = stft_loss(x, y, fft_size=fft_size, shift_size=shift_size,
                        win_length=win_length)
    jax.block_until_ready((sc, mag))
    print("KERNEL_OK")
</pallas_src>

<mosaic_0001>
module attributes {stable_mosaic.version = 11 : i64} {
  func.func @_stft_loss_kernel(%arg0: i32, %arg1: i32, %arg2: memref<1x24x128xbf16, #tpu.memory_space<vmem>>, %arg3: memref<1x24x128xbf16, #tpu.memory_space<vmem>>, %arg4: memref<128x256xbf16, #tpu.memory_space<vmem>>, %arg5: memref<1x8x128xf32, #tpu.memory_space<vmem>>, %arg6: memref<1x8x128xf32, #tpu.memory_space<vmem>>, %arg7: memref<3xf32, #tpu.memory_space<smem>>) attributes {dimension_semantics = [#tpu.dimension_semantics<parallel>, #tpu.dimension_semantics<arbitrary>], iteration_bounds = array<i64: 2, 1>, scalar_prefetch = 0 : i64, scratch_operands = 1 : i64, tpu.core_type = #tpu.core_type<tc>, window_params = [{transform_indices = @transform_0, window_bounds = array<i64: 1, 24, 128>}, {transform_indices = @transform_1, window_bounds = array<i64: 1, 24, 128>}, {pipeline_mode = #tpu.pipeline_mode<synchronous>, transform_indices = @transform_2, window_bounds = array<i64: 128, 256>}, {transform_indices = @transform_3, window_bounds = array<i64: 1, 8, 128>}, {transform_indices = @transform_4, window_bounds = array<i64: 1, 8, 128>}]} {
    %c0_i32 = arith.constant 0 : i32
    %0 = arith.cmpi eq, %arg1, %c0_i32 : i32
    %1 = arith.extui %0 : i1 to i32
    %c0_i32_0 = arith.constant 0 : i32
    %2 = arith.cmpi ne, %1, %c0_i32_0 : i32
    scf.if %2 {
      %cst_22 = arith.constant 0.000000e+00 : f32
      %c0_23 = arith.constant 0 : index
      %73 = memref.load %arg7[%c0_23] : memref<3xf32, #tpu.memory_space<smem>>
      memref.store %cst_22, %arg7[%c0_23] : memref<3xf32, #tpu.memory_space<smem>>
      %cst_24 = arith.constant 0.000000e+00 : f32
      %c1_25 = arith.constant 1 : index
      %74 = memref.load %arg7[%c1_25] : memref<3xf32, #tpu.memory_space<smem>>
      memref.store %cst_24, %arg7[%c1_25] : memref<3xf32, #tpu.memory_space<smem>>
      %cst_26 = arith.constant 0.000000e+00 : f32
      %c2_27 = arith.constant 2 : index
      %75 = memref.load %arg7[%c2_27] : memref<3xf32, #tpu.memory_space<smem>>
      memref.store %cst_26, %arg7[%c2_27] : memref<3xf32, #tpu.memory_space<smem>>
    } else {
    }
    %c0 = arith.constant 0 : index
    %c0_1 = arith.constant 0 : index
    %3 = vector.load %arg4[%c0, %c0_1] : memref<128x256xbf16, #tpu.memory_space<vmem>>, vector<128x256xbf16>
    %c0_2 = arith.constant 0 : index
    %c0_3 = arith.constant 0 : index
    %c0_4 = arith.constant 0 : index
    %4 = vector.load %arg2[%c0_2, %c0_3, %c0_4] : memref<1x24x128xbf16, #tpu.memory_space<vmem>>, vector<1x24x128xbf16>
    %5 = vector.shape_cast %4 : vector<1x24x128xbf16> to vector<24x128xbf16>
    %cst = arith.constant dense<0.000000e+00> : vector<24x256xf32>
    %6 = tpu.matmul %5, %3, %cst {dimension_numbers = #tpu.dot_dimension_numbers<[1], [0], [0], [1], [0, 0, 1, 1], [], []>} : vector<24x128xbf16>, vector<128x256xbf16>, vector<24x256xf32> -> vector<24x256xf32>
    %c0_5 = arith.constant 0 : index
    %c0_6 = arith.constant 0 : index
    %c0_7 = arith.constant 0 : index
    %7 = vector.load %arg3[%c0_5, %c0_6, %c0_7] : memref<1x24x128xbf16, #tpu.memory_space<vmem>>, vector<1x24x128xbf16>
    %8 = vector.shape_cast %7 : vector<1x24x128xbf16> to vector<24x128xbf16>
    %cst_8 = arith.constant dense<0.000000e+00> : vector<24x256xf32>
    %9 = tpu.matmul %8, %3, %cst_8 {dimension_numbers = #tpu.dot_dimension_numbers<[1], [0], [0], [1], [0, 0, 1, 1], [], []>} : vector<24x128xbf16>, vector<128x256xbf16>, vector<24x256xf32> -> vector<24x256xf32>
    %10 = vector.extract_strided_slice %6 {offsets = [0, 0], sizes = [24, 128], strides = [1, 1]} : vector<24x256xf32> to vector<24x128xf32>
    %11 = vector.extract_strided_slice %6 {offsets = [0, 128], sizes = [24, 128], strides = [1, 1]} : vector<24x256xf32> to vector<24x128xf32>
    %12 = vector.extract_strided_slice %9 {offsets = [0, 0], sizes = [24, 128], strides = [1, 1]} : vector<24x256xf32> to vector<24x128xf32>
    %13 = vector.extract_strided_slice %9 {offsets = [0, 128], sizes = [24, 128], strides = [1, 1]} : vector<24x256xf32> to vector<24x128xf32>
    %14 = arith.mulf %10, %10 : vector<24x128xf32>
    %15 = arith.mulf %11, %11 : vector<24x128xf32>
    %16 = arith.addf %14, %15 : vector<24x128xf32>
    %cst_9 = arith.constant 1.000000e-07 : f32
    %17 = vector.broadcast %cst_9 : f32 to vector<24x128xf32>
    %18 = arith.maximumf %16, %17 : vector<24x128xf32>
    %19 = math.sqrt %18 : vector<24x128xf32>
    %20 = arith.mulf %12, %12 : vector<24x128xf32>
    %21 = arith.mulf %13, %13 : vector<24x128xf32>
    %22 = arith.addf %20, %21 : vector<24x128xf32>
    %cst_10 = arith.constant 1.000000e-07 : f32
    %23 = vector.broadcast %cst_10 : f32 to vector<24x128xf32>
    %24 = arith.maximumf %22, %23 : vector<24x128xf32>
    %25 = math.sqrt %24 : vector<24x128xf32>
    %26 = tpu.iota {dimensions = array<i32: 0>} : vector<24x128xi32>
    %c24_i32 = arith.constant 24 : i32
    %27 = arith.muli %arg1, %c24_i32 : i32
    %28 = vector.broadcast %27 : i32 to vector<24x128xi32>
    %29 = arith.addi %26, %28 : vector<24x128xi32>
    %30 = tpu.iota {dimensions = array<i32: 1>} : vector<24x128xi32>
    %c17_i32 = arith.constant 17 : i32
    %31 = vector.broadcast %c17_i32 : i32 to vector<24x128xi32>
    %32 = arith.cmpi slt, %29, %31 : vector<24x128xi32>
    %c65_i32 = arith.constant 65 : i32
    %33 = vector.broadcast %c65_i32 : i32 to vector<24x128xi32>
    %34 = arith.cmpi slt, %30, %33 : vector<24x128xi32>
    %35 = arith.andi %32, %34 : vector<24x128xi1>
    %cst_11 = arith.constant 1.000000e+00 : f32
    %cst_12 = arith.constant 0.000000e+00 : f32
    %36 = vector.broadcast %cst_11 : f32 to vector<24x128xf32>
    %37 = vector.broadcast %cst_12 : f32 to vector<24x128xf32>
    %38 = arith.select %35, %36, %37 : vector<24x128xi1>, vector<24x128xf32>
    %39 = arith.subf %25, %19 : vector<24x128xf32>
    %40 = tpu.reciprocal %19 {approx = true} : vector<24x128xf32> -> vector<24x128xf32>
    %41 = arith.mulf %25, %40 : vector<24x128xf32>
    %42 = math.log %41 : vector<24x128xf32>
    %c0_13 = arith.constant 0 : index
    %43 = memref.load %arg7[%c0_13] : memref<3xf32, #tpu.memory_space<smem>>
    %44 = arith.mulf %39, %39 : vector<24x128xf32>
    %45 = arith.mulf %38, %44 : vector<24x128xf32>
    %46 = vector.shape_cast %45 : vector<24x128xf32> to vector<1x24x128xf32>
    %cst_14 = arith.constant dense<0.000000e+00> : vector<1xf32>
    %47 = vector.multi_reduction <add>, %46, %cst_14 [1, 2] : vector<1x24x128xf32> to vector<1xf32>
    %48 = vector.shape_cast %47 : vector<1xf32> to vector<1x1x1xf32>
    %49 = vector.extract %48[0, 0, 0] : f32 from vector<1x1x1xf32>
    %50 = arith.addf %43, %49 : f32
    %c0_15 = arith.constant 0 : index
    %51 = memref.load %arg7[%c0_15] : memref<3xf32, #tpu.memory_space<smem>>
    memref.store %50, %arg7[%c0_15] : memref<3xf32, #tpu.memory_space<smem>>
    %c1 = arith.constant 1 : index
    %52 = memref.load %arg7[%c1] : memref<3xf32, #tpu.memory_space<smem>>
    %53 = arith.mulf %25, %25 : vector<24x128xf32>
    %54 = arith.mulf %38, %53 : vector<24x128xf32>
    %55 = vector.shape_cast %54 : vector<24x128xf32> to vector<1x24x128xf32>
    %cst_16 = arith.constant dense<0.000000e+00> : vector<1xf32>
    %56 = vector.multi_reduction <add>, %55, %cst_16 [1, 2] : vector<1x24x128xf32> to vector<1xf32>
    %57 = vector.shape_cast %56 : vector<1xf32> to vector<1x1x1xf32>
    %58 = vector.extract %57[0, 0, 0] : f32 from vector<1x1x1xf32>
    %59 = arith.addf %52, %58 : f32
    %c1_17 = arith.constant 1 : index
    %60 = memref.load %arg7[%c1_17] : memref<3xf32, #tpu.memory_space<smem>>
    memref.store %59, %arg7[%c1_17] : memref<3xf32, #tpu.memory_space<smem>>
    %c2 = arith.constant 2 : index
    %61 = memref.load %arg7[%c2] : memref<3xf32, #tpu.memory_space<smem>>
    %62 = math.absf %42 : vector<24x128xf32>
    %63 = arith.mulf %38, %62 : vector<24x128xf32>
    %64 = vector.shape_cast %63 : vector<24x128xf32> to vector<1x24x128xf32>
    %cst_18 = arith.constant dense<0.000000e+00> : vector<1xf32>
    %65 = vector.multi_reduction <add>, %64, %cst_18 [1, 2] : vector<1x24x128xf32> to vector<1xf32>
    %66 = vector.shape_cast %65 : vector<1xf32> to vector<1x1x1xf32>
    %67 = vector.extract %66[0, 0, 0] : f32 from vector<1x1x1xf32>
    %68 = arith.addf %61, %67 : f32
    %c2_19 = arith.constant 2 : index
    %69 = memref.load %arg7[%c2_19] : memref<3xf32, #tpu.memory_space<smem>>
    memref.store %68, %arg7[%c2_19] : memref<3xf32, #tpu.memory_space<smem>>
    %c0_i32_20 = arith.constant 0 : i32
    %70 = arith.cmpi eq, %arg1, %c0_i32_20 : i32
    %71 = arith.extui %70 : i1 to i32
    %c0_i32_21 = arith.constant 0 : i32
    %72 = arith.cmpi ne, %71, %c0_i32_21 : i32
    scf.if %72 {
      %c0_22 = arith.constant 0 : index
      %73 = memref.load %arg7[%c0_22] : memref<3xf32, #tpu.memory_space<smem>>
      %c1_23 = arith.constant 1 : index
      %74 = memref.load %arg7[%c1_23] : memref<3xf32, #tpu.memory_space<smem>>
      %75 = arith.divf %73, %74 : f32
      %76 = math.sqrt %75 : f32
      %c2_24 = arith.constant 2 : index
      %77 = memref.load %arg7[%c2_24] : memref<3xf32, #tpu.memory_space<smem>>
      %cst_25 = arith.constant 1.105000e+03 : f32
      %78 = arith.divf %77, %cst_25 : f32
      %79 = vector.broadcast %76 : f32 to vector<8x128xf32>
      %c0_26 = arith.constant 0 : index
      %c0_27 = arith.constant 0 : index
      %c0_28 = arith.constant 0 : index
      %80 = vector.load %arg5[%c0_26, %c0_27, %c0_28] : memref<1x8x128xf32, #tpu.memory_space<vmem>>, vector<1x8x128xf32>
      %81 = vector.shape_cast %80 : vector<1x8x128xf32> to vector<8x128xf32>
      %82 = vector.shape_cast %79 : vector<8x128xf32> to vector<1x8x128xf32>
      tpu.vector_store %arg5[%c0_26, %c0_27, %c0_28], %82 {strides = array<i32>} : memref<1x8x128xf32, #tpu.memory_space<vmem>>, vector<1x8x128xf32>,
      %83 = vector.broadcast %78 : f32 to vector<8x128xf32>
      %c0_29 = arith.constant 0 : index
      %c0_30 = arith.constant 0 : index
      %c0_31 = arith.constant 0 : index
      %84 = vector.load %arg6[%c0_29, %c0_30, %c0_31] : memref<1x8x128xf32, #tpu.memory_space<vmem>>, vector<1x8x128xf32>
      %85 = vector.shape_cast %84 : vector<1x8x128xf32> to vector<8x128xf32>
      %86 = vector.shape_cast %83 : vector<8x128xf32> to vector<1x8x128xf32>
      tpu.vector_store %arg6[%c0_29, %c0_30, %c0_31], %86 {strides = array<i32>} : memref<1x8x128xf32, #tpu.memory_space<vmem>>, vector<1x8x128xf32>,
    } else {
    }
    return
  }
  func.func @transform_0(%arg0: i32, %arg1: i32) -> (i32, i32, i32) {
    %c0_i32 = arith.constant 0 : i32
    %c0_i32_0 = arith.constant 0 : i32
    return %arg0, %arg1, %c0_i32 : i32, i32, i32
  }
  func.func @transform_1(%arg0: i32, %arg1: i32) -> (i32, i32, i32) {
    %c0_i32 = arith.constant 0 : i32
    %c0_i32_0 = arith.constant 0 : i32
    return %arg0, %arg1, %c0_i32 : i32, i32, i32
  }
  func.func @transform_2(%arg0: i32, %arg1: i32) -> (i32, i32) {
    %c0_i32 = arith.constant 0 : i32
    %c0_i32_0 = arith.constant 0 : i32
    %c0_i32_1 = arith.constant 0 : i32
    return %c0_i32, %c0_i32_0 : i32, i32
  }
  func.func @transform_3(%arg0: i32, %arg1: i32) -> (i32, i32, i32) {
    %c0_i32 = arith.constant 0 : i32
    %c0_i32_0 = arith.constant 0 : i32
    %c0_i32_1 = arith.constant 0 : i32
    return %arg0, %c0_i32, %c0_i32_0 : i32, i32, i32
  }
  func.func @transform_4(%arg0: i32, %arg1: i32) -> (i32, i32, i32) {
    %c0_i32 = arith.constant 0 : i32
    %c0_i32_0 = arith.constant 0 : i32
    %c0_i32_1 = arith.constant 0 : i32
    return %arg0, %c0_i32, %c0_i32_0 : i32, i32, i32
  }
}

</mosaic_0001>

<bundles_post_ra>
// kernel: tpu_custom_call.1
= control target key start
LH: loop header
LB: loop body
LE: loop exit
PB: predicated region body
PF: predicated region fallthrough
CT: control target
= control target key end

     0   :  { %s1581_s0 = inlined_call_operand.hbm [shape: bf16[2,24,128], index: 0, kind: input, shape index: {}]   ;;  %s1582_s1 = inlined_call_operand.hbm [shape: bf16[2,24,128], index: 1, kind: input, shape index: {}]   ;;  %s1583_s2 = inlined_call_operand.hbm [shape: bf16[128,256], index: 2, kind: input, shape index: {}]   ;;  %s1584_s3 = inlined_call_operand.hbm [shape: f32[2,8,128], index: 3, kind: output, shape index: {0}]   ;;  %s1585_s4 = inlined_call_operand.hbm [shape: f32[2,8,128], index: 4, kind: output, shape index: {1}]  }
   0x1   :  { %1590 = sst [smem:[#allocation21_spill]] %s1581_s0 }
   0x2   :  { %1591 = sst [smem:[#allocation22_spill]] %s1583_s2 }
   0x3   :  { %10 = vsyncpa [#allocation4], 0 }
   0x4   :  { %12 = vsyncpa [#allocation4 + $0x1], 0 }
   0x5   :  { %13 = vsyncpa [#allocation7], 0 }
   0x6   :  { %15 = vsyncpa [#allocation7 + $0x1], 0 }
   0x7   :  { %16 = vsyncpa [#allocation5], 0 }
   0x8   :  { %18 = vsyncpa [#allocation5 + $0x1], 0 }
   0x9   :  { %19 = vsyncpa [#allocation11], 0 }
   0xa   :  { %21 = vsyncpa [#allocation11 + $0x1], 0  ;;  %s1348_s15 = smov 0   ;;  %s1350_s16 = smov 0  }
   0xb   :  { %s1352_s17 = smov 0   ;;  %s1354_s18 = smov 0  }
   0xc   :  { %s1356_s19 = smov 0   ;;  %s1358_s20 = smov 0  }
   0xd LB: > { %1592 = sst [smem:[#allocation17_spill]] %s1298_s17  ;;  %s1379_s21 = sadd.s32 4294967295, %s1310_s20   ;;  %s1310_s20 = sphi %s1358_s20, %s27_s20   ;;  %s1306_s19 = sphi %s1356_s19, %s1613_s19   ;;  %s1302_s18 = sphi %s1354_s18, %s1612_s18   ;;  %s1298_s17 = sphi %s1352_s17, %s1608_s17   ;;  %s1294_s16 = sphi %s1350_s16, %s1611_s16   ;;  %s1290_s15 = sphi %s1348_s15, %s1610_s15  }
   0xe   : > { %1593 = sst [smem:[#allocation18_spill]] %s1310_s20  ;;  %s910_s22 = sadd.s32 4294967294, %s1310_s20  }
   0xf   : > { %p61_p0 = scmp.ne.s32.totalorder %s1294_s16, %s1290_s15  ;;  %p62_p1 = scmp.eq.s32.totalorder %s1379_s21, 0 }
  0x10   : > { %p140_p3 = scmp.eq.s32.totalorder %s910_s22, 1  ;;  %p911_p5 = scmp.ge.s32.totalorder %s1310_s20, 1 }
  0x11   : > { %p1388_p4 = por %p62_p1, %p61_p0  ;;  %p173_p7 = scmp.lt.s32.totalorder %s1310_s20, 3 }
  0x12   : > { %p1393_p6 = por %p140_p3, %p61_p0  ;;  %s1312_s26 = smov [#allocation8]  }
  0x13   : > { %p1398_p8 = pnand %p911_p5, %p173_p7  ;;  %s185_s27 = sshll.u32 %s1312_s26, 4  ;;  %s186_s27 = int_to_ptr.vmem [resolvable:$true] %s185_s27 }
  0x14   : > { %s1595_s24 = scalar_select %p1393_p6, 1, 0 }
  0x15   : > { %p977_p9 = pneg %p1398_p8  ;;  %p913_p10 = scmp.ge.s32.totalorder %s1310_s20, 2 }
  0x16   : > { %s39_s29 = sadd.s32 1, %s1306_s19  ;;  %s1121_s30 = scalar_lea.vmem %s186_s27, 2048 }
  0x17   : > { %p1407_p11 = pnand %p977_p9, %p62_p1  ;;  %p1122_p13 = scmp.ne.s32.totalorder %s186_s27, %s1121_s30 }
  0x18   : > { %p1129_p5 = scmp.lt.s32.totalorder %s186_s27, %s186_s27  ;;  %p1130_p7 = scmp.lt.s32.totalorder %s1121_s30, %s1121_s30 }
  0x19   : > { %p1112_p12 = pneg %p1407_p11 }
  0x1a   : > { %p1131_p2 = por %p1130_p7, %p1129_p5 }
  0x1b   : > { %p1124_p0 = pnand %p1122_p13, %p1112_p12 }
  0x1d   : > { %p1125_p3 = pneg %p1124_p0 }
  0x1f   : > { %p1132_p6 = pnand %p1131_p2, %p1125_p3 }
  0x21   : > { %1135 = shalt.err (!%p1132_p6)
}
  0x22   : > { %s1313_s5 = smov 128   ;;  %s1314_s6 = smov 8  }
  0x23   : > { %s1598_s2 = sld [smem:[#allocation22_spill]]  ;;  %p41_p2 = scmp.ge.s32.totalorder %s39_s29, 2 }
  0x24   : > { %s48_s9 = sadd.s32 1, %s1298_s17  ;;  %p55_p6 = scmp.ne.s32.totalorder %s1298_s17, %s1294_s16 }
  0x25   : > { %p56_p9 = scmp.eq.s32.totalorder %s1310_s20, 0  ;;  %s1615_s29 = smov (%p41_p2, %s39_s29), 0 }
  0x26   : > { %1599 = sst [smem:[#allocation19_spill]] %s1615_s29  ;;  %p1600_p13 = scmp.eq.s32.totalorder %s1379_s21, 1 }
  0x27   : > { %p57_p12 = por %p56_p9, %p55_p6  ;;  %s43_s11 = ssub.s32 %s1306_s19, %s1615_s29 }
  0x28   : > { %p1427_p0 = por %p1600_p13, %p55_p6  ;;  %p996_p3 = scmp.lt.s32.totalorder %s1310_s20, 2 }
  0x29   : > { %980 = dma.hbm_to_vmem [thread:$0]  (!%p1407_p11), %s1598_s2, 2048, %s186_s27, [#allocation7], %s1313_s5, %s1313_s5, %s1314_s6  }
  0x2a   : > { %p46_p5 = scmp.eq.s32.totalorder %s43_s11, 0  ;;  %s199_s12 = sand.u32 1, %s1298_s17  }
  0x2b   : > { %s1435_s13 = smul.u32 12, %s199_s12  ;;  %p1442_p11 = pnand %p996_p3, %p57_p12 }
  0x2c   : > { %s1438_s14 = scalar_select %p46_p5, %s1298_s17, %s48_s9  }
  0x2d   : > { %s951_s22 = smul.u32 192, %s1306_s19  ;;  %s203_s26 = scalar_lea.vmem [#allocation3], %s1435_s13 }
  0x2e   : > { %1602 = sst [smem:[#allocation20_spill]] %s1438_s14  ;;  %s212_s27 = sshll.u32 %s203_s26, 4  ;;  %s213_s27 = int_to_ptr.vmem [resolvable:$true] %s212_s27 }
  0x2f   : > { %s1604_s0 = sld [smem:[#allocation21_spill]]  ;;  %s222_s7 = sand.u32 1, %s1310_s20  }
  0x30   : > { %s200_s8 = scalar_lea.sflag [#allocation4], %s199_s12  ;;  %p1138_p7 = pneg %p1442_p11 }
  0x31   : > { %s1149_s9 = scalar_lea.vmem %s213_s27, 192  ;;  %s1315_s11 = smov [#allocation3]  }
  0x32   : > { %p1150_p2 = scmp.ne.s32.totalorder %s213_s27, %s1149_s9  ;;  %s1154_s26 = sshll.u32 %s1315_s11, 4  ;;  %s1155_s26 = int_to_ptr.vmem [resolvable:$false] %s1154_s26 }
  0x33   : > { %s1156_s2 = scalar_lea.vmem %s1155_s26, 384  ;;  %p1157_p12 = scmp.lt.s32.totalorder %s213_s27, %s1155_s26 }
  0x34   : > { %p1152_p6 = pnand %p1150_p2, %p1138_p7  ;;  %p1158_p13 = scmp.lt.s32.totalorder %s1156_s2, %s1149_s9 }
  0x35   : > { %s211_s6 = scalar_lea.hbm %s1604_s0, %s951_s22 }
  0x36   : > { %p1153_p9 = pneg %p1152_p6  ;;  %p1159_p3 = por %p1158_p13, %p1157_p12 }
  0x38   : > { %p1160_p5 = pnand %p1159_p3, %p1153_p9 }
  0x3a   : > { %1163 = shalt.err (!%p1160_p5)
}
  0x3b   : > { %s1316_s30 = smov 64   ;;  %s1317_s12 = smov 4  }
  0x3c   : > { %984 = dma.hbm_to_vmem [thread:$0]  (!%p1442_p11), %s211_s6, 192, %s213_s27, %s200_s8, %s1316_s30, %s1316_s30, %s1317_s12  }
  0x3d   : > { %s234_s11 = scalar_lea.hbm %s1582_s1, %s951_s22  ;;  %s226_s29 = scalar_lea.vmem [#allocation6], %s1435_s13 }
  0x3e   : > { %s235_s14 = sshll.u32 %s226_s29, 4  ;;  %s223_s2 = scalar_lea.sflag [#allocation7], %s222_s7  ;;  %s236_s14 = int_to_ptr.vmem [resolvable:$true] %s235_s14 }
  0x3f   : > { %s1177_s9 = scalar_lea.vmem %s236_s14, 192  ;;  %s1318_s26 = smov [#allocation6]  }
  0x40   : > { %p1178_p2 = scmp.ne.s32.totalorder %s236_s14, %s1177_s9  ;;  %s1182_s17 = sshll.u32 %s1318_s26, 4  ;;  %s1183_s17 = int_to_ptr.vmem [resolvable:$false] %s1182_s17 }
  0x41   : > { %s1184_s20 = scalar_lea.vmem %s1183_s17, 384  ;;  %p1185_p12 = scmp.lt.s32.totalorder %s236_s14, %s1183_s17 }
  0x42   : > { %p1180_p6 = pnand %p1178_p2, %p1138_p7  ;;  %p1186_p13 = scmp.lt.s32.totalorder %s1184_s20, %s1177_s9 }
  0x44   : > { %p1181_p9 = pneg %p1180_p6  ;;  %p1187_p3 = por %p1186_p13, %p1185_p12 }
  0x46   : > { %p1188_p5 = pnand %p1187_p3, %p1181_p9 }
  0x48   : > { %1191 = shalt.err (!%p1188_p5)
}
  0x49   : > { %987 = dma.hbm_to_vmem [thread:$0]  (!%p1442_p11), %s234_s11, 192, %s236_s14, %s223_s2, %s1316_s30, %s1316_s30, %s1317_s12  }
  0x4a   : > { %247 = sbr.rel (%p1398_p8) target bundleno = 709 (0x2c5), region = 32  ;;  %s1473_s0 = sand.u32 (!%p1398_p8), 1, %s1294_s16  }
  0x4b   : > { %s954_s29 = smul.u32 (!%p1398_p8), 12, %s1473_s0  ;;  %s250_s13 = scalar_lea.sflag (!%p1398_p8), [#allocation4], %s1473_s0 }
  0x4d   : > { %s1477_s22 = scalar_lea.vmem (!%p1398_p8), [#allocation3], %s954_s29 }
  0x4f   : > { %1269 = dma.done.wait (%p1388_p4), %s250_s13, 192  }
  0x50   : > { %1271 = vsyncadd (%p1388_p4), %s250_s13, 4294967104  ;;  %s258_s17 = sand.u32 1, %s1379_s21   ;;  %s1484_s25 = scalar_lea.vmem [#allocation6], %s954_s29 }
  0x51   : > { %s259_s20 = scalar_lea.sflag [#allocation7], %s258_s17 }
  0x52   : > { %1273 = dma.done.wait (%p1388_p4), %s259_s20, 192  }
  0x53   : > { %1275 = vsyncadd (%p1388_p4), %s259_s20, 4294967104 }
  0x54   : > { %1277 = dma.done.wait (%p62_p1), [#allocation7], 2048  }
  0x55   : > { %1279 = vsyncadd (%p62_p1), [#allocation7], 4294965248  ;;  %v1319_v0 = vmov 0   ;;  %v1054_v1 = vld [vmem:[#allocation8 + $0x74] ss:$8 sps:$4 sm:$0xff]   ;;  %v604_v61 = vlaneseq  ;;  %s918_s14 = sshll.u32 %s1473_s0, 3 }
  0x56   : > { %455 = vmatprep.mubr.bf16.mxu0 %v1319_v0  ;;  %519 = vmatprep.mubr.bf16.mxu1 %v1319_v0  ;;  %v1056_v2 = vld [vmem:[#allocation8 + $0x70] ss:$8 sps:$4 sm:$0xff]   ;;  %v1057_v3 = vld [vmem:[#allocation8 + $0x64] ss:$8 sps:$4 sm:$0xff]   ;;  %v1059_v4 = vld [vmem:[#allocation8 + $0x60] ss:$8 sps:$4 sm:$0xff]  }
  0x57   : > { %423 = vmatprep.subr.bf16.mxu0 %v1054_v1  ;;  %487 = vmatprep.subr.bf16.mxu1 %v1054_v1  ;;  %v1060_v5 = vld [vmem:[#allocation8 + $0x54] ss:$8 sps:$4 sm:$0xff]   ;;  %v1062_v6 = vld [vmem:[#allocation8 + $0x50] ss:$8 sps:$4 sm:$0xff]   ;;  %v1063_v7 = vld [vmem:[#allocation8 + $0x44] ss:$8 sps:$4 sm:$0xff]  }
  0x58   : > { %424 = vmatpush1.bf16.msra.mxu0 %v1056_v2  ;;  %488 = vmatpush1.bf16.msra.mxu1 %v1056_v2  ;;  %v1065_v8 = vld [vmem:[#allocation8 + $0x40] ss:$8 sps:$4 sm:$0xff]   ;;  %v1066_v9 = vld [vmem:[#allocation8 + $0x34] ss:$8 sps:$4 sm:$0xff]   ;;  %v1068_v10 = vld [vmem:[#allocation8 + $0x30] ss:$8 sps:$4 sm:$0xff]  }
  0x59   : > { %425 = vmatprep.subr.bf16.mxu0 %v1057_v3  ;;  %489 = vmatprep.subr.bf16.mxu1 %v1057_v3  ;;  %v1069_v11 = vld [vmem:[#allocation8 + $0x24] ss:$8 sps:$4 sm:$0xff]   ;;  %v1071_v12 = vld [vmem:[#allocation8 + $0x20] ss:$8 sps:$4 sm:$0xff]   ;;  %v1072_v13 = vld [vmem:[#allocation8 + $0x14] ss:$8 sps:$4 sm:$0xff]  }
  0x5a   : > { %v1074_v14 = vld [vmem:[#allocation8 + $0x10] ss:$8 sps:$4 sm:$0xff]   ;;  %v1075_v15 = vld [vmem:[#allocation8 + $0x4] ss:$8 sps:$4 sm:$0xff]   ;;  %v1077_v16 = vld [vmem:[#allocation8] ss:$8 sps:$4 sm:$0xff]  }
  0x5b   : > { %v1078_v17 = vld [vmem:[%s1477_s22] sm:$0xff]   ;;  %v1079_v18 = vld [vmem:[%s1484_s25] sm:$0xff]   ;;  %v1080_v19 = vld [vmem:[%s1477_s22 + $0x8] ss:$0 sps:$4 sm:$0xff]   ;;  %v605_v62 = vshrl.u32 %v604_v61, 7  ;;  %s946_s27 = sshll.u32 %s1302_s18, 7 }
  0x5c   : > { %426 = vmatpush1.bf16.msra.mxu0 %v1059_v4  ;;  %490 = vmatpush1.bf16.msra.mxu1 %v1059_v4  ;;  %v1081_v20 = vld [vmem:[%s1484_s25 + $0x8] ss:$0 sps:$4 sm:$0xff]   ;;  %s300_s28 = scalar_lea.vmem [#allocation10], %s918_s14  ;;  %s1512_s5 = scalar_lea.hbm %s1585_s4, %s946_s27 }
  0x5d   : > { %427 = vmatprep.subr.bf16.mxu0 %v1060_v5  ;;  %491 = vmatprep.subr.bf16.mxu1 %v1060_v5  ;;  %v607_v5 = vadd.s32 16, %v605_v62  ;;  %s761_s6 = sshll.u32 %s300_s28, 4  ;;  %s735_s11 = scalar_lea.sflag [#allocation11], %s1473_s0  ;;  %s762_s6 = int_to_ptr.vmem [resolvable:$true] %s761_s6 }
  0x5e   : > { %s1192_s2 = scalar_lea.vmem %s762_s6, 128  ;;  %s1321_s9 = smov [#allocation10]  }
  0x5f   : > { %vm617_vm6 = vcmp.lt.s32.totalorder %v607_v5, 17  ;;  %p1193_p1 = scmp.ne.s32.totalorder %s762_s6, %s1192_s2  ;;  %s1196_s26 = sshll.u32 %s1321_s9, 4  ;;  %s1197_s26 = int_to_ptr.vmem [resolvable:$false] %s1196_s26 }
  0x60   : > { %428 = vmatpush1.bf16.msra.mxu0 %v1062_v6  ;;  %492 = vmatpush1.bf16.msra.mxu1 %v1062_v6  ;;  %s1198_s29 = scalar_lea.vmem %s1197_s26, 256  ;;  %p1199_p11 = scmp.lt.s32.totalorder %s762_s6, %s1197_s26 }
  0x61   : > { %429 = vmatprep.subr.bf16.mxu0 %v1063_v7  ;;  %493 = vmatprep.subr.bf16.mxu1 %v1063_v7  ;;  %p1194_p4 = pnand %p1193_p1, %p1427_p0  ;;  %p1200_p7 = scmp.lt.s32.totalorder %s1198_s29, %s1192_s2 }
  0x63   : > { %p1195_p8 = pneg %p1194_p4  ;;  %p1201_p2 = por %p1200_p7, %p1199_p11 }
  0x64   : > { %430 = vmatpush1.bf16.msra.mxu0 %v1065_v8  ;;  %494 = vmatpush1.bf16.msra.mxu1 %v1065_v8 }
  0x65   : > { %431 = vmatprep.subr.bf16.mxu0 %v1066_v9  ;;  %495 = vmatprep.subr.bf16.mxu1 %v1066_v9  ;;  %p1202_p6 = pnand %p1201_p2, %p1195_p8 }
  0x68   : > { %432 = vmatpush1.bf16.msra.mxu0 %v1068_v10  ;;  %496 = vmatpush1.bf16.msra.mxu1 %v1068_v10 }
  0x69   : > { %433 = vmatprep.subr.bf16.mxu0 %v1069_v11  ;;  %497 = vmatprep.subr.bf16.mxu1 %v1069_v11 }
  0x6c   : > { %434 = vmatpush1.bf16.msra.mxu0 %v1071_v12  ;;  %498 = vmatpush1.bf16.msra.mxu1 %v1071_v12 }
  0x6d   : > { %435 = vmatprep.subr.bf16.mxu0 %v1072_v13  ;;  %499 = vmatprep.subr.bf16.mxu1 %v1072_v13 }
  0x70   : > { %436 = vmatpush1.bf16.msra.mxu0 %v1074_v14  ;;  %500 = vmatpush1.bf16.msra.mxu1 %v1074_v14 }
  0x71   : > { %437 = vmatprep.subr.bf16.mxu0 %v1075_v15  ;;  %501 = vmatprep.subr.bf16.mxu1 %v1075_v15 }
  0x74   : > { %438 = vmatpush1.bf16.msra.mxu0 %v1077_v16  ;;  %502 = vmatpush1.bf16.msra.mxu1 %v1077_v16 }
  0x77   : > { %456 = vmatmul.mubr.bf16.vlgmr.msra.gmra.mxu0 %v1078_v17  ;;  %520 = vmatmul.mubr.bf16.vlgmr.msra.gmra.mxu1 %v1079_v18 }
  0x78   : > { %465 = vmatprep.mubr.bf16.mxu0 %v1319_v0  ;;  %529 = vmatprep.mubr.bf16.mxu1 %v1319_v0  ;;  %v614_v0 = vand.u32 127, %v604_v61 }
  0x7a   : > { %vm618_vm4 = vcmp.lt.s32.totalorder %v614_v0, 65 }
  0x7b   : > { %vm621_vm14 = vmand %vm617_vm6, %vm618_vm4 }
  0x7f   : > { %466 = vmatmul.mubr.bf16.gmra.mxu0 %v1080_v19  ;;  %530 = vmatmul.mubr.bf16.gmra.mxu1 %v1081_v20 }
 0x137   : > { %v457_v21 = vpop.f32.mrf.mxu0  ;;  %v521_v22 = vpop.f32.mrf.mxu1 }
 0x138   : > { %v538_v25 = vmul.f32 %v457_v21, %v457_v21  ;;  %v571_v26 = vmul.f32 %v521_v22, %v521_v22 }
 0x139   : > { %v459_v23 = vpop.f32.mrf.mxu0  ;;  %v523_v24 = vpop.f32.mrf.mxu1 }
 0x13a   : > { %v541_v27 = vmul.f32 %v459_v23, %v459_v23  ;;  %v574_v28 = vmul.f32 %v523_v24, %v523_v24 }
 0x13b   : > { %v461_v29 = vpop.f32.mrf.mxu0  ;;  %v525_v30 = vpop.f32.mrf.mxu1 }
 0x13c   : > { %v544_v31 = vadd.f32 %v541_v27, %v538_v25  ;;  %v577_v32 = vadd.f32 %v574_v28, %v571_v26  ;;  %v539_v33 = vmul.f32 %v461_v29, %v461_v29  ;;  %v572_v34 = vmul.f32 %v525_v30, %v525_v30 }
 0x13d   : > { %v463_v35 = vpop.f32.mrf.mxu0  ;;  %v527_v36 = vpop.f32.mrf.mxu1 }
 0x13e   : > { %v547_v37 = vmax.f32 %v544_v31, 1e-07  ;;  %v580_v38 = vmax.f32 %v577_v32, 1e-07  ;;  %v542_v39 = vmul.f32 %v463_v35, %v463_v35  ;;  %v575_v40 = vmul.f32 %v527_v36, %v527_v36 }
 0x13f   : > { %v467_v41 = vpop.f32.mrf.mxu0  ;;  %v531_v42 = vpop.f32.mrf.mxu1  ;;  %v1320_v35 = vmov 0.0  }
 0x140   : > { %1082 = vrsqrt.f32 %v547_v37  ;;  %v545_v43 = vadd.f32 %v542_v39, %v539_v33  ;;  %v578_v44 = vadd.f32 %v575_v40, %v572_v34  ;;  %v540_v45 = vmul.f32 %v467_v41, %v467_v41 }
 0x141   : > { %1084 = vrsqrt.f32 %v580_v38  ;;  %v573_v46 = vmul.f32 %v531_v42, %v531_v42  ;;  %v469_v47 = vpop.f32.mrf.mxu0  ;;  %v533_v48 = vpop.f32.mrf.mxu1  ;;  %vm552_vm0 = vcmp.eq.f32.partialorder %v547_v37, inf  ;;  %v555_v3 = vand.u32 2147483648, %v547_v37 }
 0x142   : > { %v548_v49 = vmax.f32 %v545_v43, 1e-07  ;;  %v581_v50 = vmax.f32 %v578_v44, 1e-07  ;;  %v543_v51 = vmul.f32 %v469_v47, %v469_v47  ;;  %v576_v52 = vmul.f32 %v533_v48, %v533_v48 }
 0x143   : > { %v471_v53 = vpop.f32.mrf.mxu0  ;;  %v535_v54 = vpop.f32.mrf.mxu1  ;;  %vm554_vm1 = vcmp.eq.f32.partialorder %v547_v37, 0.0  ;;  %vm585_vm2 = vcmp.eq.f32.partialorder %v580_v38, inf  ;;  %v588_v7 = vand.u32 2147483648, %v580_v38  ;;  %vm587_vm3 = vcmp.eq.f32.partialorder %v580_v38, 0.0 }
 0x144   : > { %1086 = vrsqrt.f32 %v548_v49  ;;  %v546_v55 = vadd.f32 %v543_v51, %v540_v45  ;;  %v579_v56 = vadd.f32 %v576_v52, %v573_v46  ;;  %vm559_vm5 = vcmp.eq.f32.partialorder %v548_v49, inf }
 0x145   : > { %1088 = vrsqrt.f32 %v581_v50  ;;  %v472_v57 = vpop.f32.mrf.mxu0  ;;  %v536_v58 = vpop.f32.mrf.mxu1  ;;  %v562_v14 = vand.u32 2147483648, %v548_v49  ;;  %vm561_vm7 = vcmp.eq.f32.partialorder %v548_v49, 0.0  ;;  %vm592_vm8 = vcmp.eq.f32.partialorder %v581_v50, inf }
 0x146   : > { %v549_v59 = vmax.f32 %v546_v55, 1e-07  ;;  %v582_v60 = vmax.f32 %v579_v56, 1e-07  ;;  %v595_v17 = vand.u32 2147483648, %v581_v50  ;;  %vm594_vm9 = vcmp.eq.f32.partialorder %v581_v50, 0.0 }
 0x147   : > { %v622_v36 = vsel %vm618_vm4, 1.0, %v1320_v35  ;;  %v624_v44 = vsel %vm621_vm14, 1.0, %v1320_v35 }
 0x148   : > { %1090 = vrsqrt.f32 %v549_v59  ;;  %vm566_vm10 = vcmp.eq.f32.partialorder %v549_v59, inf  ;;  %vm568_vm11 = vcmp.eq.f32.partialorder %v549_v59, 0.0  ;;  %v569_v25 = vand.u32 2147483648, %v549_v59 }
 0x149   : > { %1092 = vrsqrt.f32 %v582_v60  ;;  %vm599_vm12 = vcmp.eq.f32.partialorder %v582_v60, inf  ;;  %vm601_vm13 = vcmp.eq.f32.partialorder %v582_v60, 0.0  ;;  %v602_v29 = vand.u32 2147483648, %v582_v60 }
 0x14d   : > { %v1083_v63 = vpop.eup %1082 }
 0x14e   : > { %v1085_v1 = vpop.eup %1084  ;;  %v551_v2 = vmul.f32 %v1083_v63, %v547_v37 }
 0x14f   : > { %v584_v4 = vmul.f32 %v1085_v1, %v580_v38 }
 0x150   : > { %v553_v6 = vsel %vm552_vm0, %v547_v37, %v551_v2 }
 0x151   : > { %v1087_v8 = vpop.eup %1086  ;;  %v556_v9 = vsel %vm554_vm1, %v555_v3, %v553_v6  ;;  %v586_v10 = vsel %vm585_vm2, %v580_v38, %v584_v4 }
 0x152   : > { %v1089_v11 = vpop.eup %1088  ;;  %v558_v12 = vmul.f32 %v1087_v8, %v548_v49  ;;  %v589_v13 = vsel %vm587_vm3, %v588_v7, %v586_v10  ;;  %1094 = vrcp.f32 %v556_v9 }
 0x153   : > { %v591_v15 = vmul.f32 %v1089_v11, %v581_v50  ;;  %v625_v21 = vsub.f32 %v589_v13, %v556_v9  ;;  %v662_v42 = vmul.f32 %v589_v13, %v589_v13 }
 0x154   : > { %v560_v16 = vsel %vm559_vm5, %v548_v49, %v558_v12 }
 0x155   : > { %v1091_v18 = vpop.eup %1090  ;;  %v563_v19 = vsel %vm561_vm7, %v562_v14, %v560_v16  ;;  %v593_v20 = vsel %vm592_vm8, %v581_v50, %v591_v15  ;;  %v641_v32 = vmul.f32 %v625_v21, %v625_v21  ;;  %v665_v51 = vmul.f32 %v662_v42, %v622_v36 }
 0x156   : > { %v1093_v22 = vpop.eup %1092  ;;  %v565_v23 = vmul.f32 %v1091_v18, %v549_v59  ;;  %v596_v24 = vsel %vm594_vm9, %v595_v17, %v593_v20  ;;  %1096 = vrcp.f32 %v563_v19 }
 0x157   : > { %v598_v26 = vmul.f32 %v1093_v22, %v582_v60  ;;  %v626_v27 = vsub.f32 %v596_v24, %v563_v19  ;;  %v663_v39 = vmul.f32 %v596_v24, %v596_v24  ;;  %v644_v41 = vmul.f32 %v641_v32, %v622_v36 }
 0x158   : > { %v567_v28 = vsel %vm566_vm10, %v549_v59, %v565_v23 }
 0x159   : > { %v570_v30 = vsel %vm568_vm11, %v569_v25, %v567_v28  ;;  %v600_v31 = vsel %vm599_vm12, %v582_v60, %v598_v26  ;;  %v642_v33 = vmul.f32 %v626_v27, %v626_v27  ;;  %v666_v48 = vmul.f32 %v663_v39, %v622_v36 }
 0x15a   : > { %v603_v34 = vsel %vm601_vm13, %v602_v29, %v600_v31  ;;  %1098 = vrcp.f32 %v570_v30 }
 0x15b   : > { %v627_v37 = vsub.f32 %v603_v34, %v570_v30  ;;  %v645_v38 = vmul.f32 %v642_v33, %v622_v36  ;;  %v664_v43 = vmul.f32 %v603_v34, %v603_v34  ;;  %v668_v54 = vadd.f32 %v666_v48, %v665_v51 }
 0x15d   : > { %v643_v40 = vmul.f32 %v627_v37, %v627_v37  ;;  %v647_v47 = vadd.f32 %v645_v38, %v644_v41  ;;  %v667_v52 = vmul.f32 %v664_v43, %v624_v44 }
 0x15f   : > { %v1095_v45 = vpop.eup %1094  ;;  %v646_v46 = vmul.f32 %v643_v40, %v624_v44  ;;  %v669_v56 = vadd.f32 %v668_v54, %v667_v52 }
 0x160   : > { %v631_v49 = vmul.f32 %v1095_v45, %v589_v13 }
 0x161   : > { %v648_v50 = vadd.f32 %v647_v47, %v646_v46 }
 0x162   : > { %1100 = vlog2.f32 %v631_v49 }
 0x163   : > { %v1097_v53 = vpop.eup %1096  ;;  %649 = vadd.xlane.f32.xlu0 %v648_v50 }
 0x164   : > { %v632_v55 = vmul.f32 %v1097_v53, %v596_v24 }
 0x166   : > { %1102 = vlog2.f32 %v632_v55 }
 0x167   : > { %v1099_v57 = vpop.eup %1098  ;;  %670 = vadd.xlane.f32.xlu0 %v669_v56 }
 0x168   : > { %v633_v58 = vmul.f32 %v1099_v57, %v603_v34 }
 0x16a   : > { %1104 = vlog2.f32 %v633_v58 }
 0x16f   : > { %v1101_v59 = vpop.eup %1100 }
 0x170   : > { %v635_v60 = vmul.f32 0.6931472, %v1101_v59 }
 0x172   : > { %v683_v63 = vand.u32 2147483647, %v635_v60 }
 0x173   : > { %v1103_v61 = vpop.eup %1102 }
 0x174   : > { %v637_v62 = vmul.f32 0.6931472, %v1103_v61  ;;  %v686_v5 = vmul.f32 %v683_v63, %v622_v36 }
 0x176   : > { %v684_v0 = vand.u32 2147483647, %v637_v62 }
 0x177   : > { %v1105_v1 = vpop.eup %1104 }
 0x178   : > { %v639_v2 = vmul.f32 0.6931472, %v1105_v1  ;;  %v687_v3 = vmul.f32 %v684_v0, %v622_v36 }
 0x17a   : > { %v685_v4 = vand.u32 2147483647, %v639_v2  ;;  %v689_v7 = vadd.f32 %v687_v3, %v686_v5 }
 0x17c   : > { %v688_v6 = vmul.f32 %v685_v4, %v624_v44 }
 0x17e   : > { %v690_v8 = vadd.f32 %v689_v7, %v688_v6 }
 0x180   : > { %691 = vadd.xlane.f32.xlu1 %v690_v8 }
 0x1ec   : > { %v650_v9 = vpop.xlane.xlu0 %649 }
 0x1ed   : > { %v651_v10 = vrot.slane %v650_v9, 4 }
 0x1ef   : > { %v652_v11 = vadd.f32 %v651_v10, %v650_v9 }
 0x1f0   : > { %v671_v12 = vpop.xlane.xlu0 %670 }
 0x1f1   : > { %v653_v13 = vrot.slane %v652_v11, 2  ;;  %v672_v14 = vrot.slane %v671_v12, 4 }
 0x1f3   : > { %v673_v15 = vadd.f32 %v672_v14, %v671_v12  ;;  %v654_v16 = vadd.f32 %v653_v13, %v652_v11 }
 0x1f5   : > { %v674_v17 = vrot.slane %v673_v15, 2  ;;  %v655_v18 = vrot.slane %v654_v16, 1 }
 0x1f7   : > { %v675_v19 = vadd.f32 %v674_v17, %v673_v15  ;;  %v656_v20 = vadd.f32 %v655_v18, %v654_v16 }
 0x1f9   : > { %955 = vpush %v656_v20  ;;  %v676_v21 = vrot.slane %v675_v19, 1 }
 0x1fb   : > { %v677_v22 = vadd.f32 %v676_v21, %v675_v19 }
 0x1fd   : > { %957 = vpush %v677_v22 }
 0x209   : > { %v692_v23 = vpop.xlane.xlu1 %691 }
 0x20a   : > { %v693_v24 = vrot.slane %v692_v23, 4 }
 0x20c   : > { %v694_v25 = vadd.f32 %v693_v24, %v692_v23 }
 0x20e   : > { %v695_v26 = vrot.slane %v694_v25, 2 }
 0x210   : > { %v696_v27 = vadd.f32 %v695_v26, %v694_v25 }
 0x212   : > { %v697_v28 = vrot.slane %v696_v27, 1 }
 0x214   : > { %v698_v29 = vadd.f32 %v697_v28, %v696_v27 }
 0x216   : > { %959 = vpush %v698_v29 }
 0x22a   : > { %s1501_s21 = spop %955 }
 0x22e   : > { %s958_s23 = spop %957 }
 0x22f   : > { %v708_v30 = vstv %s958_s23 }
 0x230   : > { %1106 = vrcp.f32 %v708_v30 }
 0x23d   : > { %v1107_v31 = vpop.eup %1106 }
 0x23e   : > { %961 = vpush %v1107_v31 }
 0x247   : > { %s960_s7 = spop %959 }
 0x248   : > { %s724_s8 = smul.f32 0.0009049774, %s960_s7 }
 0x24a   : > { %v727_v32 = vstv %s724_s8 }
 0x24b   : > { %728 = vst [vmem:[%s300_s28] sm:$0xff] %v727_v32 }
 0x24c   : > { %1205 = shalt.err (!%p1202_p6)
}
 0x24d   : > { %s1206_s13 = scalar_lea.hbm %s1512_s5, 128  ;;  %s1210_s20 = scalar_lea.hbm %s1585_s4, 256 }
 0x24e   : > { %p1207_p9 = scmp.ne.s32.totalorder %s1512_s5, %s1206_s13  ;;  %p1211_p3 = scmp.lt.s32.totalorder %s1512_s5, %s1585_s4 }
 0x24f   : > { %p1212_p5 = scmp.lt.s32.totalorder %s1210_s20, %s1206_s13 }
 0x250   : > { %p1208_p12 = pnand %p1207_p9, %p1427_p0 }
 0x251   : > { %p1213_p1 = por %p1212_p5, %p1211_p3 }
 0x252   : > { %p1209_p13 = pneg %p1208_p12 }
 0x254   : > { %p1214_p4 = pnand %p1213_p1, %p1209_p13 }
 0x256   : > { %1217 = shalt.err (!%p1214_p4)
}
 0x257   : > { %974 = dma.vmem_to_hbm [thread:$0]  (%p1427_p0), %s762_s6, 128, %s1512_s5, %s735_s11  }
 0x258   : > { %s293_s8 = scalar_lea.vmem [#allocation9], %s918_s14  ;;  %s746_s5 = scalar_lea.hbm %s1584_s3, %s946_s27 }
 0x259   : > { %s748_s30 = sshll.u32 %s293_s8, 4  ;;  %s730_s11 = scalar_lea.sflag [#allocation5], %s1473_s0  ;;  %s1534_s30 = int_to_ptr.vmem [resolvable:$true] %s748_s30 }
 0x25a   : > { %s1218_s2 = scalar_lea.vmem %s1534_s30, 128  ;;  %s1322_s14 = smov [#allocation9]  }
 0x25b   : > { %p1219_p8 = scmp.ne.s32.totalorder %s1534_s30, %s1218_s2  ;;  %s1222_s9 = sshll.u32 %s1322_s14, 4  ;;  %s1223_s9 = int_to_ptr.vmem [resolvable:$false] %s1222_s9 }
 0x25c   : > { %s1224_s26 = scalar_lea.vmem %s1223_s9, 256  ;;  %p1225_p2 = scmp.lt.s32.totalorder %s1534_s30, %s1223_s9 }
 0x25d   : > { %p1220_p11 = pnand %p1219_p8, %p1427_p0  ;;  %p1226_p6 = scmp.lt.s32.totalorder %s1224_s26, %s1218_s2 }
 0x25f   : > { %p1221_p7 = pneg %p1220_p11  ;;  %p1227_p9 = por %p1226_p6, %p1225_p2 }
 0x261   : > { %p1228_p12 = pnand %p1227_p9, %p1221_p7 }
 0x26f   : > { %s962_s28 = spop %961 }
 0x270   : > { %s711_s7 = smul.f32 %s962_s28, %s1501_s21 }
 0x272   : > { %v712_v33 = vstv %s711_s7 }
 0x273   : > { %1108 = vrsqrt.f32 %v712_v33  ;;  %vm715_vm15 = vcmp.eq.f32.partialorder %v712_v33, inf  ;;  %v718_v36 = vand.u32 2147483648, %v712_v33  ;;  %vm717_vm0 = vcmp.eq.f32.partialorder %v712_v33, 0.0 }
 0x280   : > { %v1109_v34 = vpop.eup %1108 }
 0x281   : > { %v714_v35 = vmul.f32 %v1109_v34, %v712_v33 }
 0x283   : > { %v716_v37 = vsel %vm715_vm15, %v712_v33, %v714_v35 }
 0x284   : > { %v719_v38 = vsel %vm717_vm0, %v718_v36, %v716_v37 }
 0x285   : > { %963 = vpush %v719_v38 }
 0x2b6   : > { %s964_s21 = spop %963 }
 0x2b7   : > { %v725_v39 = vstv %s964_s21 }
 0x2b8   : > { %726 = vst [vmem:[%s293_s8] sm:$0xff] %v725_v39 }
 0x2b9   : > { %1231 = shalt.err (!%p1228_p12)
}
 0x2ba   : > { %s1232_s18 = scalar_lea.hbm %s746_s5, 128  ;;  %s1236_s29 = scalar_lea.hbm %s1584_s3, 256 }
 0x2bb   : > { %p1233_p13 = scmp.ne.s32.totalorder %s746_s5, %s1232_s18  ;;  %p1237_p1 = scmp.lt.s32.totalorder %s746_s5, %s1584_s3 }
 0x2bc   : > { %p1238_p4 = scmp.lt.s32.totalorder %s1236_s29, %s1232_s18 }
 0x2bd   : > { %p1234_p3 = pnand %p1233_p13, %p1427_p0 }
 0x2be   : > { %p1239_p8 = por %p1238_p4, %p1237_p1 }
 0x2bf   : > { %p1235_p5 = pneg %p1234_p3 }
 0x2c1   : > { %p1240_p11 = pnand %p1239_p8, %p1235_p5 }
 0x2c3   : > { %1243 = shalt.err (!%p1240_p11)
}
 0x2c4   : > { %973 = dma.vmem_to_hbm [thread:$0]  (%p1427_p0), %s1534_s30, 128, %s746_s5, %s730_s11  }
 0x2c5 PF: > { %s1605_s17 = sld [smem:[#allocation18_spill]]  ;;  %s773_s20 = sand.u32 1, %s1290_s15  }
 0x2c6   : > { %p1606_p7 = scmp.ne.s32.totalorder %s1595_s24, 0  ;;  %s774_s25 = scalar_lea.sflag [#allocation5], %s773_s20 }
 0x2c8   : > { %p989_p2 = pnand %p913_p10, %p1606_p7 }
 0x2ca   : > { %p990_p6 = pneg %p989_p2 }
 0x2cc   : > { %1281 = dma.done.wait (%p990_p6), %s774_s25, 128  }
 0x2cd   : > { %1283 = vsyncadd (%p990_p6), %s774_s25, 4294967168  ;;  %s783_s23 = scalar_lea.sflag [#allocation11], %s773_s20 }
 0x2ce   : > { %1285 = dma.done.wait (%p990_p6), %s783_s23, 128  }
 0x2cf   : > { %1287 = vsyncadd (%p990_p6), %s783_s23, 4294967168  ;;  %s27_s20 = sadd.s32 1, %s1605_s17   ;;  %s1607_s10 = sld [smem:[#allocation17_spill]] }
 0x2d0   : > { %p24_p9 = scmp.ge.s32.totalorder %s27_s20, 4   ;;  %s1608_s17 = sld [smem:[#allocation20_spill]] }
 0x2d1   : > { %s1609_s28 = sld [smem:[#allocation19_spill]]  ;;  %s1610_s15 = smov %s1294_s16 }
 0x2d2   : > { %s1612_s18 = smov %s1306_s19 }
 0x2d3   :  { %26 = sbr.rel (!%p24_p9) target bundleno = 13 (0xd), region = 125 }
 0x2d5   : > { %s1611_s16 = smov %s1607_s10 }
 0x2d7   : > { %s1613_s19 = smov %s1609_s28 }
 0x2d8   :  { %788 = vsyncpa [#allocation4], 1 }
 0x2d9   :  { %790 = vsyncpa [#allocation4 + $0x1], 1 }
 0x2da   :  { %791 = vsyncpa [#allocation7], 1 }
 0x2db   :  { %793 = vsyncpa [#allocation7 + $0x1], 1 }
 0x2dc   :  { %794 = vsyncpa [#allocation5], 1 }
 0x2dd   :  { %796 = vsyncpa [#allocation5 + $0x1], 1 }
 0x2de   :  { %797 = vsyncpa [#allocation11], 1 }
 0x2df   :  { %799 = vsyncpa [#allocation11 + $0x1], 1 }

</bundles_post_ra>
